<compile_context>
chip_gen: v6e
topology: v6e:2x2x1
jax: 0.10.0
libtpu: 0.0.40
codegen_flags: <defaults>
</compile_context>

<pallas_src>
import functools

import jax
import jax.numpy as jnp
from jax.experimental import pallas as pl
from jax.experimental.pallas import tpu as pltpu

LEAKY_SLOPE = 0.01  # PyTorch nn.LeakyReLU default negative_slope
LANE = 128
SUBLANE = 8


def _round_up(n: int, m: int) -> int:
    return ((n + m - 1) // m) * m


def _fused_mlp_kernel(x_ref, *refs, n_layers: int):
    """Whole MLP for one batch tile.

    refs = (w0, b0, w1, b1, ..., w_{L-1}, b_{L-1}, o_ref)
    x_ref: [TB, D0p]  w_i: [D_ip, D_{i+1}p]  b_i: [1, D_{i+1}p]  o_ref: [TB, DLp]
    Intermediates live in vregs; LeakyReLU on the f32 accumulator, single cast
    at the end.
    """
    o_ref = refs[2 * n_layers]
    h = x_ref[...].astype(jnp.float32)
    for i in range(n_layers):
        w = refs[2 * i][...]
        b = refs[2 * i + 1][...]
        # TODO(synk): for large widths cast h/w to bf16 here (keep f32 accumulate).
        h = jnp.dot(h, w, preferred_element_type=jnp.float32) + b
        if i < n_layers - 1:
            h = jnp.where(h >= 0, h, LEAKY_SLOPE * h)
    o_ref[...] = h.astype(o_ref.dtype)


def init_dense_params(key, layer_structure):
    """nn.Linear-style uniform(-k, k), k = 1/sqrt(fan_in).  w: [in, out]."""
    params = []
    for back, front in zip(layer_structure[:-1], layer_structure[1:]):
        key, kw, kb = jax.random.split(key, 3)
        bound = 1.0 / jnp.sqrt(back)
        w = jax.random.uniform(kw, (back, front), jnp.float32, -bound, bound)
        b = jax.random.uniform(kb, (front,), jnp.float32, -bound, bound)
        params.append((w, b))
    return params


def pad_dense_params(params):
    """Zero-pad every layer's K and N dims to multiples of 128 (done once)."""
    padded = []
    for w, b in params:
        din, dout = w.shape
        din_p, dout_p = _round_up(din, LANE), _round_up(dout, LANE)
        w_p = jnp.zeros((din_p, dout_p), w.dtype).at[:din, :dout].set(w)
        b_p = jnp.zeros((1, dout_p), b.dtype).at[0, :dout].set(b)
        padded.append((w_p, b_p))
    return padded


def dense_forward(x, params, *, block_batch=256):
    """Fused Dense forward: Linear -> LeakyReLU -> ... -> Linear (no act last).

    x: [..., Din].  Leading dims are flattened into a batch axis; the kernel
    runs a 1-D grid over batch tiles with all weights VMEM-resident.
    """
    padded = pad_dense_params(params)
    n_layers = len(padded)
    din = params[0][0].shape[0]
    dout = params[-1][0].shape[1]
    din_p = padded[0][0].shape[0]
    dout_p = padded[-1][0].shape[1]

    lead_shape = x.shape[:-1]
    x2 = x.reshape(-1, din)
    B = x2.shape[0]

    # Batch tile: multiple of 8, capped; pad batch rows to a tile multiple.
    tb = min(_round_up(B, SUBLANE), block_batch)
    b_p = _round_up(B, tb)
    x_p = jnp.zeros((b_p, din_p), x2.dtype).at[:B, :din].set(x2)

    grid = (b_p // tb,)

    in_specs = [pl.BlockSpec((tb, din_p), lambda i: (i, 0))]
    flat_params = []
    for w_p, bias_p in padded:
        in_specs.append(pl.BlockSpec(w_p.shape, lambda i: (0, 0)))    # resident
        in_specs.append(pl.BlockSpec(bias_p.shape, lambda i: (0, 0)))  # resident
        flat_params += [w_p, bias_p]
    out_specs = pl.BlockSpec((tb, dout_p), lambda i: (i, 0))

    flops = int(2 * b_p * sum(w.shape[0] * w.shape[1] for w, _ in padded))
    bytes_accessed = int(
        (x_p.size + b_p * dout_p + sum(w.size + b.size for w, b in padded)) * 4
    )

    kernel = functools.partial(_fused_mlp_kernel, n_layers=n_layers)

    out = pl.pallas_call(
        kernel,
        out_shape=jax.ShapeDtypeStruct((b_p, dout_p), x2.dtype),
        grid=grid,
        in_specs=in_specs,
        out_specs=out_specs,
        compiler_params=pltpu.CompilerParams(
            dimension_semantics=("parallel",)
        ),
        cost_estimate=pl.CostEstimate(
            flops=flops, transcendentals=0, bytes_accessed=bytes_accessed
        ),
    )(x_p, *flat_params)

    out = out[:B, :dout]
    return out.reshape(*lead_shape, dout)


def _reference_dense(x, params):
    h = x
    for i, (w, b) in enumerate(params):
        h = h @ w + b
        if i < len(params) - 1:
            h = jnp.where(h >= 0, h, LEAKY_SLOPE * h)
    return h


if __name__ == "__main__":
    key = jax.random.PRNGKey(0)

    # --- Demo 1: 3-layer Dense (like `to_edge = Dense([dim, dim, edim])`) on
    #             node-style input [batch, seq, dim].
    layer_structure = [32, 64, 48, 16]
    key, kx, kp = jax.random.split(key, 3)
    nodes = jax.random.normal(kx, (2, 8, layer_structure[0]), jnp.float32)
    params = init_dense_params(kp, layer_structure)

    out = dense_forward(nodes, params)
    out = jax.block_until_ready(out)
    ref = _reference_dense(nodes, params)
    assert out.shape == (2, 8, layer_structure[-1])
    assert jnp.allclose(out, ref, atol=1e-5, rtol=1e-5)

    # --- Demo 2: single-layer Dense (like a distance binner Dense([edim, nbins]))
    #             on edge-style input [batch, s, z, edim].
    key, ke, kp2 = jax.random.split(key, 3)
    edges = jax.random.normal(ke, (2, 8, 8, 32), jnp.float32)
    binner_params = init_dense_params(kp2, [32, 24])

    bins = dense_forward(edges, binner_params)
    bins = jax.block_until_ready(bins)
    bins_ref = _reference_dense(edges, binner_params)
    assert bins.shape == (2, 8, 8, 24)
    assert jnp.allclose(bins, bins_ref, atol=1e-5, rtol=1e-5)

    print("KERNEL_OK")
</pallas_src>

<mosaic_0001>
module attributes {stable_mosaic.version = 11 : i64} {
  func.func @_fused_mlp_kernel(%arg0: i32, %arg1: memref<16x128xf32, #tpu.memory_space<vmem>>, %arg2: memref<128x128xf32, #tpu.memory_space<vmem>>, %arg3: memref<1x128xf32, #tpu.memory_space<vmem>>, %arg4: memref<128x128xf32, #tpu.memory_space<vmem>>, %arg5: memref<1x128xf32, #tpu.memory_space<vmem>>, %arg6: memref<128x128xf32, #tpu.memory_space<vmem>>, %arg7: memref<1x128xf32, #tpu.memory_space<vmem>>, %arg8: memref<16x128xf32, #tpu.memory_space<vmem>>) attributes {dimension_semantics = [#tpu.dimension_semantics<parallel>], iteration_bounds = array<i64: 1>, scalar_prefetch = 0 : i64, scratch_operands = 0 : i64, tpu.core_type = #tpu.core_type<tc>, window_params = [{transform_indices = @transform_0, window_bounds = array<i64: 16, 128>}, {pipeline_mode = #tpu.pipeline_mode<synchronous>, transform_indices = @transform_1, window_bounds = array<i64: 128, 128>}, {pipeline_mode = #tpu.pipeline_mode<synchronous>, transform_indices = @transform_2, window_bounds = array<i64: 1, 128>}, {pipeline_mode = #tpu.pipeline_mode<synchronous>, transform_indices = @transform_3, window_bounds = array<i64: 128, 128>}, {pipeline_mode = #tpu.pipeline_mode<synchronous>, transform_indices = @transform_4, window_bounds = array<i64: 1, 128>}, {pipeline_mode = #tpu.pipeline_mode<synchronous>, transform_indices = @transform_5, window_bounds = array<i64: 128, 128>}, {pipeline_mode = #tpu.pipeline_mode<synchronous>, transform_indices = @transform_6, window_bounds = array<i64: 1, 128>}, {transform_indices = @transform_7, window_bounds = array<i64: 16, 128>}]} {
    %c0 = arith.constant 0 : index
    %c0_0 = arith.constant 0 : index
    %0 = vector.load %arg1[%c0, %c0_0] : memref<16x128xf32, #tpu.memory_space<vmem>>, vector<16x128xf32>
    %c0_1 = arith.constant 0 : index
    %c0_2 = arith.constant 0 : index
    %1 = vector.load %arg2[%c0_1, %c0_2] : memref<128x128xf32, #tpu.memory_space<vmem>>, vector<128x128xf32>
    %c0_3 = arith.constant 0 : index
    %c0_4 = arith.constant 0 : index
    %2 = vector.load %arg3[%c0_3, %c0_4] : memref<1x128xf32, #tpu.memory_space<vmem>>, vector<1x128xf32>
    %cst = arith.constant dense<0.000000e+00> : vector<16x128xf32>
    %3 = tpu.matmul %0, %1, %cst {dimension_numbers = #tpu.dot_dimension_numbers<[1], [0], [0], [1], [0, 0, 1, 1], [], []>} : vector<16x128xf32>, vector<128x128xf32>, vector<16x128xf32> -> vector<16x128xf32>
    %4 = vector.broadcast %2 : vector<1x128xf32> to vector<16x128xf32>
    %5 = arith.addf %3, %4 : vector<16x128xf32>
    %cst_5 = arith.constant 0.000000e+00 : f32
    %6 = vector.broadcast %cst_5 : f32 to vector<16x128xf32>
    %7 = arith.cmpf oge, %5, %6 : vector<16x128xf32>
    %cst_6 = arith.constant 0.00999999977 : f32
    %8 = vector.broadcast %cst_6 : f32 to vector<16x128xf32>
    %9 = arith.mulf %8, %5 : vector<16x128xf32>
    %10 = arith.select %7, %5, %9 : vector<16x128xi1>, vector<16x128xf32>
    %c0_7 = arith.constant 0 : index
    %c0_8 = arith.constant 0 : index
    %11 = vector.load %arg4[%c0_7, %c0_8] : memref<128x128xf32, #tpu.memory_space<vmem>>, vector<128x128xf32>
    %c0_9 = arith.constant 0 : index
    %c0_10 = arith.constant 0 : index
    %12 = vector.load %arg5[%c0_9, %c0_10] : memref<1x128xf32, #tpu.memory_space<vmem>>, vector<1x128xf32>
    %cst_11 = arith.constant dense<0.000000e+00> : vector<16x128xf32>
    %13 = tpu.matmul %10, %11, %cst_11 {dimension_numbers = #tpu.dot_dimension_numbers<[1], [0], [0], [1], [0, 0, 1, 1], [], []>} : vector<16x128xf32>, vector<128x128xf32>, vector<16x128xf32> -> vector<16x128xf32>
    %14 = vector.broadcast %12 : vector<1x128xf32> to vector<16x128xf32>
    %15 = arith.addf %13, %14 : vector<16x128xf32>
    %cst_12 = arith.constant 0.000000e+00 : f32
    %16 = vector.broadcast %cst_12 : f32 to vector<16x128xf32>
    %17 = arith.cmpf oge, %15, %16 : vector<16x128xf32>
    %cst_13 = arith.constant 0.00999999977 : f32
    %18 = vector.broadcast %cst_13 : f32 to vector<16x128xf32>
    %19 = arith.mulf %18, %15 : vector<16x128xf32>
    %20 = arith.select %17, %15, %19 : vector<16x128xi1>, vector<16x128xf32>
    %c0_14 = arith.constant 0 : index
    %c0_15 = arith.constant 0 : index
    %21 = vector.load %arg6[%c0_14, %c0_15] : memref<128x128xf32, #tpu.memory_space<vmem>>, vector<128x128xf32>
    %c0_16 = arith.constant 0 : index
    %c0_17 = arith.constant 0 : index
    %22 = vector.load %arg7[%c0_16, %c0_17] : memref<1x128xf32, #tpu.memory_space<vmem>>, vector<1x128xf32>
    %cst_18 = arith.constant dense<0.000000e+00> : vector<16x128xf32>
    %23 = tpu.matmul %20, %21, %cst_18 {dimension_numbers = #tpu.dot_dimension_numbers<[1], [0], [0], [1], [0, 0, 1, 1], [], []>} : vector<16x128xf32>, vector<128x128xf32>, vector<16x128xf32> -> vector<16x128xf32>
    %24 = vector.broadcast %22 : vector<1x128xf32> to vector<16x128xf32>
    %25 = arith.addf %23, %24 : vector<16x128xf32>
    %c0_19 = arith.constant 0 : index
    %c0_20 = arith.constant 0 : index
    %26 = vector.load %arg8[%c0_19, %c0_20] : memref<16x128xf32, #tpu.memory_space<vmem>>, vector<16x128xf32>
    tpu.vector_store %arg8[%c0_19, %c0_20], %25 {strides = array<i32>} : memref<16x128xf32, #tpu.memory_space<vmem>>, vector<16x128xf32>,
    return
  }
  func.func @transform_0(%arg0: i32) -> (i32, i32) {
    %c0_i32 = arith.constant 0 : i32
    %c0_i32_0 = arith.constant 0 : i32
    return %arg0, %c0_i32 : i32, i32
  }
  func.func @transform_1(%arg0: i32) -> (i32, i32) {
    %c0_i32 = arith.constant 0 : i32
    %c0_i32_0 = arith.constant 0 : i32
    %c0_i32_1 = arith.constant 0 : i32
    return %c0_i32, %c0_i32_0 : i32, i32
  }
  func.func @transform_2(%arg0: i32) -> (i32, i32) {
    %c0_i32 = arith.constant 0 : i32
    %c0_i32_0 = arith.constant 0 : i32
    %c0_i32_1 = arith.constant 0 : i32
    return %c0_i32, %c0_i32_0 : i32, i32
  }
  func.func @transform_3(%arg0: i32) -> (i32, i32) {
    %c0_i32 = arith.constant 0 : i32
    %c0_i32_0 = arith.constant 0 : i32
    %c0_i32_1 = arith.constant 0 : i32
    return %c0_i32, %c0_i32_0 : i32, i32
  }
  func.func @transform_4(%arg0: i32) -> (i32, i32) {
    %c0_i32 = arith.constant 0 : i32
    %c0_i32_0 = arith.constant 0 : i32
    %c0_i32_1 = arith.constant 0 : i32
    return %c0_i32, %c0_i32_0 : i32, i32
  }
  func.func @transform_5(%arg0: i32) -> (i32, i32) {
    %c0_i32 = arith.constant 0 : i32
    %c0_i32_0 = arith.constant 0 : i32
    %c0_i32_1 = arith.constant 0 : i32
    return %c0_i32, %c0_i32_0 : i32, i32
  }
  func.func @transform_6(%arg0: i32) -> (i32, i32) {
    %c0_i32 = arith.constant 0 : i32
    %c0_i32_0 = arith.constant 0 : i32
    %c0_i32_1 = arith.constant 0 : i32
    return %c0_i32, %c0_i32_0 : i32, i32
  }
  func.func @transform_7(%arg0: i32) -> (i32, i32) {
    %c0_i32 = arith.constant 0 : i32
    %c0_i32_0 = arith.constant 0 : i32
    return %arg0, %c0_i32 : i32, i32
  }
}

</mosaic_0001>

<bundles_post_ra>
// kernel: tpu_custom_call.1
= control target key start
LH: loop header
LB: loop body
LE: loop exit
PB: predicated region body
PF: predicated region fallthrough
CT: control target
= control target key end

     0   :  { %12 = vsyncpa [#allocation3], 0  ;;  %s774_s0 = inlined_call_operand.hbm [shape: f32[16,128], index: 0, kind: input, shape index: {}]   ;;  %s775_s1 = inlined_call_operand.hbm [shape: f32[128,128], index: 1, kind: input, shape index: {}]   ;;  %s776_s2 = inlined_call_operand.vmem [shape: f32[1,128], index: 2, kind: input, shape index: {}]   ;;  %s777_s3 = inlined_call_operand.hbm [shape: f32[128,128], index: 3, kind: input, shape index: {}]   ;;  %s778_s4 = inlined_call_operand.vmem [shape: f32[1,128], index: 4, kind: input, shape index: {}]   ;;  %s779_s5 = inlined_call_operand.hbm [shape: f32[128,128], index: 5, kind: input, shape index: {}]   ;;  %s780_s6 = inlined_call_operand.vmem [shape: f32[1,128], index: 6, kind: input, shape index: {}]   ;;  %s781_s7 = inlined_call_operand.hbm [shape: f32[16,128], index: 7, kind: output, shape index: {}]  }
   0x1   :  { %13 = vsyncpa [#allocation6], 0 }
   0x2   :  { %14 = vsyncpa [#allocation9], 0 }
   0x3   :  { %15 = vsyncpa [#allocation4], 0  ;;  %s688_s24 = smov [#allocation5]   ;;  %s689_s26 = smov [#allocation2]  }
   0x4   :  { %s33_s25 = sshll.u32 %s688_s24, 4  ;;  %s21_s27 = sshll.u32 %s689_s26, 4  ;;  %s34_s25 = int_to_ptr.vmem [resolvable:$true] %s33_s25  ;;  %s22_s27 = int_to_ptr.vmem [resolvable:$true] %s21_s27 }
   0x5   :  { %s588_s28 = scalar_lea.vmem %s34_s25, 2048  ;;  %p593_p1 = scmp.lt.s32.totalorder %s34_s25, %s34_s25 }
   0x6   :  { %p589_p0 = scmp.ne.s32.totalorder %s34_s25, %s588_s28  ;;  %p594_p2 = scmp.lt.s32.totalorder %s588_s28, %s588_s28 }
   0x8   :  { %p595_p3 = por %p594_p2, %p593_p1 }
   0xa   :  { %p596_p4 = pnand %p595_p3, %p589_p0 }
   0xc   :  { %599 = shalt.err (!%p596_p4)
}
   0xd   :  { %s690_s29 = smov 128   ;;  %s691_s30 = smov 8  }
   0xe   :  { %39 = dma.hbm_to_vmem [thread:$0]  %s775_s1, 2048, %s34_s25, [#allocation6], %s690_s29, %s690_s29, %s691_s30  }
   0xf   :  { %s608_s10 = scalar_lea.vmem %s22_s27, 256  ;;  %p613_p6 = scmp.lt.s32.totalorder %s22_s27, %s22_s27 }
  0x10   :  { %p609_p5 = scmp.ne.s32.totalorder %s22_s27, %s608_s10  ;;  %p614_p7 = scmp.lt.s32.totalorder %s608_s10, %s608_s10 }
  0x12   :  { %p615_p8 = por %p614_p7, %p613_p6 }
  0x14   :  { %p616_p9 = pnand %p615_p8, %p609_p5 }
  0x16   :  { %619 = shalt.err (!%p616_p9)
}
  0x17   :  { %27 = dma.hbm_to_vmem [thread:$0]  %s774_s0, 256, %s22_s27, [#allocation3], %s690_s29, %s690_s29, %s691_s30  }
  0x18   :  { %s692_s13 = smov [#allocation7]   ;;  %s693_s15 = smov [#allocation8]  }
  0x19   :  { %s47_s14 = sshll.u32 %s692_s13, 4  ;;  %s61_s16 = sshll.u32 %s693_s15, 4  ;;  %s48_s14 = int_to_ptr.vmem [resolvable:$true] %s47_s14  ;;  %s62_s16 = int_to_ptr.vmem [resolvable:$true] %s61_s16 }
  0x1a   :  { %s628_s1 = scalar_lea.vmem %s48_s14, 2048  ;;  %p633_p11 = scmp.lt.s32.totalorder %s48_s14, %s48_s14 }
  0x1b   :  { %p629_p10 = scmp.ne.s32.totalorder %s48_s14, %s628_s1  ;;  %p634_p12 = scmp.lt.s32.totalorder %s628_s1, %s628_s1 }
  0x1d   :  { %p635_p13 = por %p634_p12, %p633_p11 }
  0x1f   :  { %p636_p0 = pnand %p635_p13, %p629_p10 }
  0x21   :  { %639 = shalt.err (!%p636_p0)
}
  0x22   :  { %53 = dma.hbm_to_vmem [thread:$0]  %s777_s3, 2048, %s48_s14, [#allocation6], %s690_s29, %s690_s29, %s691_s30  }
  0x23   :  { %s648_s0 = scalar_lea.vmem %s62_s16, 2048  ;;  %p653_p2 = scmp.lt.s32.totalorder %s62_s16, %s62_s16 }
  0x24   :  { %p649_p1 = scmp.ne.s32.totalorder %s62_s16, %s648_s0  ;;  %p654_p3 = scmp.lt.s32.totalorder %s648_s0, %s648_s0 }
  0x26   :  { %p655_p4 = por %p654_p3, %p653_p2 }
  0x28   :  { %p656_p5 = pnand %p655_p4, %p649_p1 }
  0x2a   :  { %659 = shalt.err (!%p656_p5)
}
  0x2b   :  { %67 = dma.hbm_to_vmem [thread:$0]  %s779_s5, 2048, %s62_s16, [#allocation9], %s690_s29, %s690_s29, %s691_s30  }
  0x2c   :  { %680 = dma.done.wait [#allocation3], 256  }
  0x2d   :  { %681 = vsyncadd [#allocation3], 4294967040 }
  0x2e   :  { %682 = dma.done.wait [#allocation6], 4096  }
  0x2f   :  { %683 = vsyncadd [#allocation6], 4294963200 }
  0x30   :  { %684 = dma.done.wait [#allocation9], 2048  }
  0x31   :  { %685 = vsyncadd [#allocation9], 4294965248  ;;  %v99_v0 = vld [vmem:[#allocation5 + $0x78] sm:$0xff]  ;;  %v98_v1 = vld [vmem:[#allocation5 + $0x70] sm:$0xff]  ;;  %s694_s24 = smov [#allocation10]  }
  0x32   :  { %468 = vmatprep.subr.mxu0 %v99_v0  ;;  %v97_v2 = vld [vmem:[#allocation5 + $0x68] sm:$0xff]  ;;  %v96_v3 = vld [vmem:[#allocation5 + $0x60] sm:$0xff]  ;;  %v82_v4 = vld [vmem:[#allocation2] sm:$0xff]  ;;  %s397_s25 = sshll.u32 %s694_s24, 4  ;;  %s398_s25 = int_to_ptr.vmem [resolvable:$true] %s397_s25 }
  0x33   :  { %469 = vmatpush3.msra.mxu0 %v99_v0  ;;  %v95_v5 = vld [vmem:[#allocation5 + $0x58] sm:$0xff]  ;;  %500 = vmatprep.mubr.f32.mxu0 %v82_v4  ;;  %v202_v7 = vld [vmem:[#allocation7 + $0x70] sm:$0xff]  ;;  %v201_v9 = vld [vmem:[#allocation7 + $0x68] sm:$0xff]  ;;  %p665_p7 = scmp.lt.s32.totalorder %s398_s25, %s398_s25 }
  0x34   :  { %470 = vmatprep.subr.mxu0 %v98_v1  ;;  %v203_v6 = vld [vmem:[#allocation7 + $0x78] sm:$0xff]  ;;  %v94_v8 = vld [vmem:[#allocation5 + $0x50] sm:$0xff]  ;;  %v93_v10 = vld [vmem:[#allocation5 + $0x48] sm:$0xff] }
  0x35   :  { %471 = vmatpush3.msra.mxu0 %v98_v1  ;;  %503 = vmatprep.subr.mxu1 %v203_v6  ;;  %v200_v11 = vld [vmem:[#allocation7 + $0x60] sm:$0xff]  ;;  %v199_v13 = vld [vmem:[#allocation7 + $0x58] sm:$0xff]  ;;  %v198_v15 = vld [vmem:[#allocation7 + $0x50] sm:$0xff] }
  0x36   :  { %472 = vmatprep.subr.mxu0 %v97_v2  ;;  %504 = vmatpush3.msra.mxu1 %v203_v6  ;;  %v92_v12 = vld [vmem:[#allocation5 + $0x40] sm:$0xff]  ;;  %v91_v14 = vld [vmem:[#allocation5 + $0x38] sm:$0xff]  ;;  %v90_v16 = vld [vmem:[#allocation5 + $0x30] sm:$0xff] }
  0x37   :  { %473 = vmatpush3.msra.mxu0 %v97_v2  ;;  %505 = vmatprep.subr.mxu1 %v202_v7  ;;  %v197_v17 = vld [vmem:[#allocation7 + $0x48] sm:$0xff]  ;;  %v196_v19 = vld [vmem:[#allocation7 + $0x40] sm:$0xff]  ;;  %v195_v21 = vld [vmem:[#allocation7 + $0x38] sm:$0xff] }
  0x38   :  { %474 = vmatprep.subr.mxu0 %v96_v3  ;;  %506 = vmatpush3.msra.mxu1 %v202_v7  ;;  %v89_v18 = vld [vmem:[#allocation5 + $0x28] sm:$0xff]  ;;  %v88_v20 = vld [vmem:[#allocation5 + $0x20] sm:$0xff]  ;;  %v87_v22 = vld [vmem:[#allocation5 + $0x18] sm:$0xff] }
  0x39   :  { %475 = vmatpush3.msra.mxu0 %v96_v3  ;;  %507 = vmatprep.subr.mxu1 %v201_v9  ;;  %v194_v23 = vld [vmem:[#allocation7 + $0x30] sm:$0xff]  ;;  %v193_v25 = vld [vmem:[#allocation7 + $0x28] sm:$0xff]  ;;  %v192_v27 = vld [vmem:[#allocation7 + $0x20] sm:$0xff] }
  0x3a   :  { %476 = vmatprep.subr.mxu0 %v95_v5  ;;  %508 = vmatpush3.msra.mxu1 %v201_v9  ;;  %v86_v24 = vld [vmem:[#allocation5 + $0x10] sm:$0xff]  ;;  %v85_v26 = vld [vmem:[#allocation5 + $0x8] sm:$0xff]  ;;  %v84_v28 = vld [vmem:[#allocation5] sm:$0xff] }
  0x3b   :  { %477 = vmatpush3.msra.mxu0 %v95_v5  ;;  %509 = vmatprep.subr.mxu1 %v200_v11  ;;  %v83_v29 = vld [vmem:[#allocation2 + $0x8] sm:$0xff]  ;;  %v190_v31 = vld [vmem:[#allocation7 + $0x10] sm:$0xff]  ;;  %v189_v32 = vld [vmem:[#allocation7 + $0x8] sm:$0xff] }
  0x3c   :  { %478 = vmatprep.subr.mxu0 %v94_v8  ;;  %510 = vmatpush3.msra.mxu1 %v200_v11  ;;  %v191_v30 = vld [vmem:[#allocation7 + $0x18] sm:$0xff]  ;;  %v188_v33 = vld [vmem:[#allocation7] sm:$0xff]  ;;  %v306_v35 = vld [vmem:[#allocation8 + $0x70] sm:$0xff] }
  0x3d   :  { %479 = vmatpush3.msra.mxu0 %v94_v8  ;;  %511 = vmatprep.subr.mxu1 %v199_v13  ;;  %v307_v34 = vld [vmem:[#allocation8 + $0x78] sm:$0xff]  ;;  %v305_v36 = vld [vmem:[#allocation8 + $0x68] sm:$0xff]  ;;  %v304_v37 = vld [vmem:[#allocation8 + $0x60] sm:$0xff] }
  0x3e   :  { %480 = vmatprep.subr.mxu0 %v93_v10  ;;  %512 = vmatpush3.msra.mxu1 %v199_v13  ;;  %v303_v38 = vld [vmem:[#allocation8 + $0x58] sm:$0xff]  ;;  %v302_v39 = vld [vmem:[#allocation8 + $0x50] sm:$0xff]  ;;  %v301_v40 = vld [vmem:[#allocation8 + $0x48] sm:$0xff] }
  0x3f   :  { %481 = vmatpush3.msra.mxu0 %v93_v10  ;;  %513 = vmatprep.subr.mxu1 %v198_v15  ;;  %v300_v41 = vld [vmem:[#allocation8 + $0x40] sm:$0xff]  ;;  %v299_v42 = vld [vmem:[#allocation8 + $0x38] sm:$0xff]  ;;  %v298_v43 = vld [vmem:[#allocation8 + $0x30] sm:$0xff] }
  0x40   :  { %482 = vmatprep.subr.mxu0 %v92_v12  ;;  %514 = vmatpush3.msra.mxu1 %v198_v15  ;;  %v297_v44 = vld [vmem:[#allocation8 + $0x28] sm:$0xff]  ;;  %v296_v45 = vld [vmem:[#allocation8 + $0x20] sm:$0xff]  ;;  %v411_v46 = vld [vmem:[%s776_s2] ss:$0 sm:$0xff] }
  0x41   :  { %483 = vmatpush3.msra.mxu0 %v92_v12  ;;  %515 = vmatprep.subr.mxu1 %v197_v17  ;;  %v295_v55 = vld [vmem:[#allocation8 + $0x18] sm:$0xff]  ;;  %v294_v56 = vld [vmem:[#allocation8 + $0x10] sm:$0xff]  ;;  %v293_v57 = vld [vmem:[#allocation8 + $0x8] sm:$0xff] }
  0x42   :  { %484 = vmatprep.subr.mxu0 %v91_v14  ;;  %516 = vmatpush3.msra.mxu1 %v197_v17  ;;  %v292_v58 = vld [vmem:[#allocation8] sm:$0xff]  ;;  %v412_v59 = vld [vmem:[%s778_s4] ss:$0 sm:$0xff]  ;;  %s660_s4 = scalar_lea.vmem %s398_s25, 256 }
  0x43   :  { %485 = vmatpush3.msra.mxu0 %v91_v14  ;;  %517 = vmatprep.subr.mxu1 %v196_v19  ;;  %v413_v4 = vld [vmem:[%s780_s6] ss:$0 sm:$0xff]  ;;  %p661_p6 = scmp.ne.s32.totalorder %s398_s25, %s660_s4  ;;  %p666_p8 = scmp.lt.s32.totalorder %s660_s4, %s660_s4 }
  0x44   :  { %486 = vmatprep.subr.mxu0 %v90_v16  ;;  %518 = vmatpush3.msra.mxu1 %v196_v19 }
  0x45   :  { %487 = vmatpush3.msra.mxu0 %v90_v16  ;;  %519 = vmatprep.subr.mxu1 %v195_v21  ;;  %p667_p9 = por %p666_p8, %p665_p7 }
  0x46   :  { %488 = vmatprep.subr.mxu0 %v89_v18  ;;  %520 = vmatpush3.msra.mxu1 %v195_v21 }
  0x47   :  { %489 = vmatpush3.msra.mxu0 %v89_v18  ;;  %521 = vmatprep.subr.mxu1 %v194_v23  ;;  %p668_p10 = pnand %p667_p9, %p661_p6 }
  0x48   :  { %490 = vmatprep.subr.mxu0 %v88_v20  ;;  %522 = vmatpush3.msra.mxu1 %v194_v23 }
  0x49   :  { %491 = vmatpush3.msra.mxu0 %v88_v20  ;;  %523 = vmatprep.subr.mxu1 %v193_v25 }
  0x4a   :  { %492 = vmatprep.subr.mxu0 %v87_v22  ;;  %524 = vmatpush3.msra.mxu1 %v193_v25 }
  0x4b   :  { %493 = vmatpush3.msra.mxu0 %v87_v22  ;;  %525 = vmatprep.subr.mxu1 %v192_v27 }
  0x4c   :  { %494 = vmatprep.subr.mxu0 %v86_v24  ;;  %526 = vmatpush3.msra.mxu1 %v192_v27 }
  0x4d   :  { %495 = vmatpush3.msra.mxu0 %v86_v24  ;;  %527 = vmatprep.subr.mxu1 %v191_v30 }
  0x4e   :  { %496 = vmatprep.subr.mxu0 %v85_v26  ;;  %528 = vmatpush3.msra.mxu1 %v191_v30 }
  0x4f   :  { %497 = vmatpush3.msra.mxu0 %v85_v26  ;;  %529 = vmatprep.subr.mxu1 %v190_v31 }
  0x50   :  { %498 = vmatprep.subr.mxu0 %v84_v28  ;;  %530 = vmatpush3.msra.mxu1 %v190_v31 }
  0x51   :  { %499 = vmatpush3.msra.mxu0 %v84_v28  ;;  %531 = vmatprep.subr.mxu1 %v189_v32 }
  0x52   :  { %501 = vmatmul.mubr.f32.vlgmr.msra.gmra.mxu0 %v83_v29  ;;  %532 = vmatpush3.msra.mxu1 %v189_v32 }
  0x53   :  { %533 = vmatprep.subr.mxu1 %v188_v33  ;;  %538 = vmatprep.subr.mxu0 %v307_v34 }
  0x54   :  { %534 = vmatpush3.msra.mxu1 %v188_v33  ;;  %539 = vmatpush3.msra.mxu0 %v307_v34 }
  0x55   :  { %540 = vmatprep.subr.mxu0 %v306_v35 }
  0x56   :  { %541 = vmatpush3.msra.mxu0 %v306_v35 }
  0x57   :  { %542 = vmatprep.subr.mxu0 %v305_v36 }
  0x58   :  { %543 = vmatpush3.msra.mxu0 %v305_v36 }
  0x59   :  { %544 = vmatprep.subr.mxu0 %v304_v37 }
  0x5a   :  { %545 = vmatpush3.msra.mxu0 %v304_v37 }
  0x5b   :  { %546 = vmatprep.subr.mxu0 %v303_v38 }
  0x5c   :  { %547 = vmatpush3.msra.mxu0 %v303_v38 }
  0x5d   :  { %548 = vmatprep.subr.mxu0 %v302_v39 }
  0x5e   :  { %549 = vmatpush3.msra.mxu0 %v302_v39 }
  0x5f   :  { %550 = vmatprep.subr.mxu0 %v301_v40 }
  0x60   :  { %551 = vmatpush3.msra.mxu0 %v301_v40 }
  0x61   :  { %552 = vmatprep.subr.mxu0 %v300_v41 }
  0x62   :  { %553 = vmatpush3.msra.mxu0 %v300_v41 }
  0x63   :  { %554 = vmatprep.subr.mxu0 %v299_v42 }
  0x64   :  { %555 = vmatpush3.msra.mxu0 %v299_v42 }
  0x65   :  { %556 = vmatprep.subr.mxu0 %v298_v43 }
  0x66   :  { %557 = vmatpush3.msra.mxu0 %v298_v43 }
  0x67   :  { %558 = vmatprep.subr.mxu0 %v297_v44 }
  0x68   :  { %559 = vmatpush3.msra.mxu0 %v297_v44 }
  0x69   :  { %560 = vmatprep.subr.mxu0 %v296_v45 }
  0x6a   :  { %561 = vmatpush3.msra.mxu0 %v296_v45 }
  0x6b   :  { %562 = vmatprep.subr.mxu0 %v295_v55 }
  0x6c   :  { %563 = vmatpush3.msra.mxu0 %v295_v55 }
  0x6d   :  { %564 = vmatprep.subr.mxu0 %v294_v56 }
  0x6e   :  { %565 = vmatpush3.msra.mxu0 %v294_v56 }
  0x6f   :  { %566 = vmatprep.subr.mxu0 %v293_v57 }
  0x70   :  { %567 = vmatpush3.msra.mxu0 %v293_v57 }
  0x71   :  { %568 = vmatprep.subr.mxu0 %v292_v58 }
  0x72   :  { %569 = vmatpush3.msra.mxu0 %v292_v58 }
 0x112   :  { %v502_v47 = vpop.f32.mrf.mxu0 }
 0x113   :  { %v179_v48 = vadd.f32 %v502_v47, %v411_v46 }
 0x114   :  { %v173_v49 = vpop.f32.mrf.mxu0 }
 0x115   :  { %v174_v50 = vadd.f32 %v411_v46, %v173_v49  ;;  %v185_v51 = vmul.f32 0.01, %v179_v48  ;;  %vm183_vm1 = vcmp.ge.f32.partialorder %v179_v48, 0.0 }
 0x117   :  { %vm182_vm0 = vcmp.ge.f32.partialorder %v174_v50, 0.0  ;;  %v184_v52 = vmul.f32 0.01, %v174_v50  ;;  %v187_v54 = vsel %vm183_vm1, %v179_v48, %v185_v51 }
 0x119   :  { %v186_v53 = vsel %vm182_vm0, %v174_v50, %v184_v52 }
 0x11a   :  { %535 = vmatprep.mubr.f32.mxu1 %v186_v53 }
 0x11b   :  { %536 = vmatmul.mubr.f32.vlgmr.msra.gmra.mxu1 %v187_v54 }
 0x1db   :  { %v537_v60 = vpop.f32.mrf.mxu1 }
 0x1dc   :  { %v283_v61 = vadd.f32 %v537_v60, %v412_v59 }
 0x1dd   :  { %v277_v62 = vpop.f32.mrf.mxu1 }
 0x1de   :  { %v278_v63 = vadd.f32 %v412_v59, %v277_v62  ;;  %v289_v0 = vmul.f32 0.01, %v283_v61  ;;  %vm287_vm2 = vcmp.ge.f32.partialorder %v283_v61, 0.0 }
 0x1e0   :  { %v288_v1 = vmul.f32 0.01, %v278_v63  ;;  %vm286_vm3 = vcmp.ge.f32.partialorder %v278_v63, 0.0  ;;  %v291_v3 = vsel %vm287_vm2, %v283_v61, %v289_v0 }
 0x1e2   :  { %v290_v2 = vsel %vm286_vm3, %v278_v63, %v288_v1 }
 0x1e3   :  { %570 = vmatprep.mubr.f32.mxu0 %v290_v2 }
 0x1e4   :  { %571 = vmatmul.mubr.f32.vlgmr.msra.gmra.mxu0 %v291_v3 }
 0x2a4   :  { %v572_v5 = vpop.f32.mrf.mxu0 }
 0x2a5   :  { %v387_v6 = vadd.f32 %v572_v5, %v413_v4 }
 0x2a6   :  { %v381_v7 = vpop.f32.mrf.mxu0 }
 0x2a7   :  { %391 = vst [vmem:[#allocation10 + $0x8] sm:$0xff] %v387_v6  ;;  %v382_v8 = vadd.f32 %v413_v4, %v381_v7 }
 0x2a9   :  { %390 = vst [vmem:[#allocation10] sm:$0xff] %v382_v8 }
 0x2aa   :  { %671 = shalt.err (!%p668_p10)
}
 0x2ab   :  { %403 = dma.vmem_to_hbm [thread:$0]  %s398_s25, 256, %s781_s7, [#allocation4], %s690_s29, %s690_s29, %s691_s30  }
 0x2ac   :  { %686 = dma.done.wait [#allocation4], 256  }
 0x2ad   :  { %687 = vsyncadd [#allocation4], 4294967040 }
 0x2ae   :  { %407 = vsyncpa [#allocation3], 1 }
 0x2af   :  { %408 = vsyncpa [#allocation6], 1 }
 0x2b0   :  { %409 = vsyncpa [#allocation9], 1 }
 0x2b1   :  { %410 = vsyncpa [#allocation4], 1 }

</bundles_post_ra>
